<compile_context>
chip_gen: v5e
topology: v5e:2x2
jax: 0.10.0
libtpu: 0.0.40
codegen_flags: <defaults>
</compile_context>

<pallas_src>
import jax
import jax.numpy as jnp
from jax.experimental import pallas as pl
from jax.experimental.pallas import tpu as pltpu


def _embed_onehot_kernel(ids_ref, w_ref, out_ref):
    # ids_ref : (1, 1, tq) int32, lane-dense token-id block for this step
    # w_ref   : (V, D) table, resident in VMEM (same block index every step)
    # out_ref : (tq, D)
    V = w_ref.shape[0]
    tq = ids_ref.shape[-1]

    # In-kernel clamp: out-of-range ids can never drive an OOB gather
    # (nn.Embedding precondition; valid inputs unchanged).
    ids = jnp.clip(ids_ref[0], 0, V - 1)                         # (1, tq)

    # One-hot laid out (V, tq): iota over sublanes, ids broadcast along
    # sublanes -> no transpose of ids needed anywhere.
    iota = jax.lax.broadcasted_iota(jnp.int32, (V, tq), 0)       # (V, tq)
    onehot = (iota == ids).astype(w_ref.dtype)                   # (V, tq)

    # Contract dim 0 of both operands: onehot^T @ table -> (tq, D) on the MXU.
    out_ref[...] = jax.lax.dot_general(
        onehot,
        w_ref[...],
        dimension_numbers=(((0,), (0,)), ((), ())),
        preferred_element_type=jnp.float32,
    ).astype(out_ref.dtype)


def embedding_forward(indices, weight, *, tq=None):
    """indices: (B, T) int, weight: (V, D) float32 -> (B, T, D) float32."""
    B, T = indices.shape
    V, D = weight.shape
    n_tok = B * T

    if tq is None:
        # Tiny inputs: pad only to the f32 sublane multiple (8).
        # Large inputs: 512-row blocks (256 KiB f32 output tiles) to amortize
        # per-grid-step overhead; also yields >=2 grid steps for v7x megacore
        # once the workload is big enough to matter.
        tq = min(512, pl.cdiv(n_tok, 8) * 8)
    n_pad = pl.cdiv(n_tok, tq) * tq
    n_blocks = n_pad // tq

    ids = indices.reshape(n_tok).astype(jnp.int32)
    # Pad the token stream to a whole number of tq-sized blocks; padded rows
    # gather row 0 and are sliced off below.
    ids = jnp.pad(ids, (0, n_pad - n_tok))
    # Lane-dense layout: each grid step reads one contiguous (1, tq) row.
    ids3d = ids.reshape(n_blocks, 1, tq)

    itemsize = weight.dtype.itemsize
    cost = pl.CostEstimate(
        flops=2 * n_pad * V * D,                  # one-hot matmul
        transcendentals=0,
        bytes_accessed=V * D * itemsize           # table read (once)
        + n_pad * D * itemsize                    # output write
        + n_pad * 4,                              # ids read
    )

    out_flat = pl.pallas_call(
        _embed_onehot_kernel,
        out_shape=jax.ShapeDtypeStruct((n_pad, D), weight.dtype),
        grid_spec=pltpu.PrefetchScalarGridSpec(
            num_scalar_prefetch=0,
            grid=(n_blocks,),
            in_specs=[
                # lane-dense token-id block for this step
                pl.BlockSpec((1, 1, tq), lambda i: (i, 0, 0)),
                # full table, same block index every step -> DMA'd from HBM
                # once, kept resident in VMEM across the grid
                pl.BlockSpec((V, D), lambda i: (0, 0)),
            ],
            out_specs=pl.BlockSpec((tq, D), lambda i: (i, 0)),
        ),
        compiler_params=pltpu.CompilerParams(
            # Disjoint output rows per step -> safe to shard across TCs (v7x).
            dimension_semantics=("parallel",),
        ),
        cost_estimate=cost,
    )(ids3d, weight)

    return out_flat[:n_tok].reshape(B, T, D)


if __name__ == "__main__":
    # Small, deterministic setup consistent with the module's forward:
    #   vocab_size=64, dim_embed=128, batch=2, text=8
    vocab_size = 64
    dim_embed = 128
    batch, text = 2, 8
    padding_idx = 0  # stands in for char2id['_']

    key = jax.random.PRNGKey(0)
    k_w, k_ids, k_big = jax.random.split(key, 3)

    # nn.Embedding default init: N(0, 1); padding_idx row zeroed.
    weight = jax.random.normal(k_w, (vocab_size, dim_embed), dtype=jnp.float32)
    weight = weight.at[padding_idx].set(0.0)

    indices = jax.random.randint(
        k_ids, (batch, text), minval=0, maxval=vocab_size, dtype=jnp.int32
    )
    # make sure some padding tokens are present
    indices = indices.at[0, 0].set(padding_idx)
    indices = indices.at[1, 3].set(padding_idx)

    out = embedding_forward(indices, weight)
    out = jax.block_until_ready(out)

    # Reference check against plain JAX gather.
    ref = jnp.take(weight, indices, axis=0)
    assert out.shape == (batch, text, dim_embed)
    assert out.dtype == jnp.float32
    assert jnp.allclose(out, ref), "Pallas embedding mismatch vs reference"
    assert jnp.all(out[0, 0] == 0.0) and jnp.all(out[1, 3] == 0.0)

    # Also exercise the multi-block path (grid > 1, tq = 512).
    big_indices = jax.random.randint(
        k_big, (4, 300), minval=0, maxval=vocab_size, dtype=jnp.int32
    )
    out_big = jax.block_until_ready(embedding_forward(big_indices, weight))
    ref_big = jnp.take(weight, big_indices, axis=0)
    assert jnp.allclose(out_big, ref_big), "multi-block path mismatch"

    print("KERNEL_OK")
</pallas_src>

<mosaic_0001>
module attributes {stable_mosaic.version = 11 : i64} {
  func.func @_embed_onehot_kernel(%arg0: i32, %arg1: memref<1x1x16xi32, #tpu.memory_space<vmem>>, %arg2: memref<64x128xf32, #tpu.memory_space<vmem>>, %arg3: memref<16x128xf32, #tpu.memory_space<vmem>>) attributes {dimension_semantics = [#tpu.dimension_semantics<parallel>], iteration_bounds = array<i64: 1>, scalar_prefetch = 0 : i64, scratch_operands = 0 : i64, tpu.core_type = #tpu.core_type<tc>, window_params = [{transform_indices = @transform_0, window_bounds = array<i64: 1, 1, 16>}, {pipeline_mode = #tpu.pipeline_mode<synchronous>, transform_indices = @transform_1, window_bounds = array<i64: 64, 128>}, {transform_indices = @transform_2, window_bounds = array<i64: 16, 128>}]} {
    %c0 = arith.constant 0 : index
    %c0_0 = arith.constant 0 : index
    %c0_1 = arith.constant 0 : index
    %0 = vector.load %arg1[%c0, %c0_0, %c0_1] : memref<1x1x16xi32, #tpu.memory_space<vmem>>, vector<1x1x16xi32>
    %1 = vector.shape_cast %0 : vector<1x1x16xi32> to vector<1x16xi32>
    %c0_i32 = arith.constant 0 : i32
    %c63_i32 = arith.constant 63 : i32
    %2 = vector.broadcast %c0_i32 : i32 to vector<1x16xi32>
    %3 = arith.maxsi %2, %1 : vector<1x16xi32>
    %4 = vector.broadcast %c63_i32 : i32 to vector<1x16xi32>
    %5 = arith.minsi %4, %3 : vector<1x16xi32>
    %6 = tpu.iota {dimensions = array<i32: 0>} : vector<64x16xi32>
    %7 = vector.broadcast %5 : vector<1x16xi32> to vector<64x16xi32>
    %8 = arith.cmpi eq, %6, %7 : vector<64x16xi32>
    %9 = arith.extui %8 : vector<64x16xi1> to vector<64x16xi32>
    %10 = arith.sitofp %9 : vector<64x16xi32> to vector<64x16xf32>
    %c0_2 = arith.constant 0 : index
    %c0_3 = arith.constant 0 : index
    %11 = vector.load %arg2[%c0_2, %c0_3] : memref<64x128xf32, #tpu.memory_space<vmem>>, vector<64x128xf32>
    %cst = arith.constant dense<0.000000e+00> : vector<16x128xf32>
    %12 = tpu.matmul %10, %11, %cst {dimension_numbers = #tpu.dot_dimension_numbers<[0], [0], [1], [1], [0, 1, 1, 1], [], []>} : vector<64x16xf32>, vector<64x128xf32>, vector<16x128xf32> -> vector<16x128xf32>
    %c0_4 = arith.constant 0 : index
    %c0_5 = arith.constant 0 : index
    %13 = vector.load %arg3[%c0_4, %c0_5] : memref<16x128xf32, #tpu.memory_space<vmem>>, vector<16x128xf32>
    tpu.vector_store %arg3[%c0_4, %c0_5], %12 {strides = array<i32>} : memref<16x128xf32, #tpu.memory_space<vmem>>, vector<16x128xf32>,
    return
  }
  func.func @transform_0(%arg0: i32) -> (i32, i32, i32) {
    %c0_i32 = arith.constant 0 : i32
    %c0_i32_0 = arith.constant 0 : i32
    %c0_i32_1 = arith.constant 0 : i32
    return %arg0, %c0_i32, %c0_i32_0 : i32, i32, i32
  }
  func.func @transform_1(%arg0: i32) -> (i32, i32) {
    %c0_i32 = arith.constant 0 : i32
    %c0_i32_0 = arith.constant 0 : i32
    %c0_i32_1 = arith.constant 0 : i32
    return %c0_i32, %c0_i32_0 : i32, i32
  }
  func.func @transform_2(%arg0: i32) -> (i32, i32) {
    %c0_i32 = arith.constant 0 : i32
    %c0_i32_0 = arith.constant 0 : i32
    return %arg0, %c0_i32 : i32, i32
  }
}

</mosaic_0001>

<bundles_post_ra>
// kernel: tpu_custom_call.1
= control target key start
LH: loop header
LB: loop body
LE: loop exit
PB: predicated region body
PF: predicated region fallthrough
CT: control target
= control target key end

     0   :  { %7 = vsyncpa [#allocation3], 0  ;;  %s311_s0 = inlined_call_operand.hbm [shape: s32[1,1,16], index: 0, kind: input, shape index: {}]   ;;  %s312_s1 = inlined_call_operand.hbm [shape: f32[64,128], index: 1, kind: input, shape index: {}]   ;;  %s313_s2 = inlined_call_operand.hbm [shape: f32[16,128], index: 2, kind: output, shape index: {}]  }
   0x1   :  { %8 = vsyncpa [#allocation6], 0 }
   0x2   :  { %9 = vsyncpa [#allocation4], 0  ;;  %s15_s11 = sshll.u32 %s311_s0, 4  ;;  %s275_s12 = smov [#allocation2]   ;;  %s16_s11 = int_to_ptr.hbm [resolvable:$true] %s15_s11 }
   0x3   :  { %s17_s13 = sshll.u32 %s275_s12, 4  ;;  %s25_s16 = sshll.u32 %s312_s1, 4  ;;  %s18_s13 = int_to_ptr.vmem [resolvable:$true] %s17_s13  ;;  %s26_s16 = int_to_ptr.hbm [resolvable:$true] %s25_s16 }
   0x4   :  { %20 = dma.hbm_to_vmem [thread:$0]  %s16_s11, 16, %s18_s13, [#allocation3]  }
   0x5   :  { %s276_s17 = smov [#allocation5]   ;;  %s277_s19 = smov 128  }
   0x6   :  { %s27_s18 = sshll.u32 %s276_s17, 4  ;;  %s278_s20 = smov 8   ;;  %s28_s18 = int_to_ptr.vmem [resolvable:$true] %s27_s18 }
   0x7   :  { %33 = dma.hbm_to_vmem [thread:$0]  %s26_s16, 1024, %s28_s18, [#allocation6], %s277_s19, %s277_s19, %s278_s20  }
   0x8   :  { %269 = dma.done.wait [#allocation3], 16  }
   0x9   :  { %270 = vsyncadd [#allocation3], 4294967280 }
   0xa   :  { %271 = dma.done.wait [#allocation6], 1024  }
   0xb   :  { %272 = vsyncadd [#allocation6], 4294966272  ;;  %v47_v0 = vlaneseq  ;;  %v42_v1 = vld [vmem:[#allocation2] sm:$0x1]  ;;  %v279_v7 = vmov 0.0   ;;  %v87_v16 = vld [vmem:[#allocation5 + $0x30] sm:$0xff] }
   0xc   :  { %vm43_vm0 = vcmp.gt.s32.totalorder %v42_v1, 0  ;;  %v88_v15 = vld [vmem:[#allocation5 + $0x38] sm:$0xff]  ;;  %v86_v17 = vld [vmem:[#allocation5 + $0x28] sm:$0xff]  ;;  %v85_v18 = vld [vmem:[#allocation5 + $0x20] sm:$0xff]  ;;  %vm121_vm10 = vcmask 523264   ;;  %s280_s0 = smov [#allocation7]  }
   0xd   :  { %v44_v2 = vsel %vm43_vm0, %v42_v1, 0  ;;  %v48_v3 = vshrl.u32 %v47_v0, 7  ;;  %136 = vmatpush.msra.mxu0 %v88_v15  ;;  %183 = vmatpush.msra.mxu1 %v88_v15  ;;  %v84_v21 = vld [vmem:[#allocation5 + $0x18] sm:$0xff]  ;;  %v83_v22 = vld [vmem:[#allocation5 + $0x10] sm:$0xff]  ;;  %v82_v23 = vld [vmem:[#allocation5 + $0x8] sm:$0xff]  ;;  %s157_s1 = sshll.u32 %s280_s0, 4  ;;  %s158_s1 = int_to_ptr.vmem [resolvable:$true] %s157_s1 }
   0xe   :  { %vm45_vm1 = vcmp.lt.s32.totalorder %v44_v2, 63  ;;  %v81_v24 = vld [vmem:[#allocation5] sm:$0xff]  ;;  %s159_s23 = sshll.u32 %s313_s2, 4  ;;  %s160_s23 = int_to_ptr.hbm [resolvable:$true] %s159_s23 }
   0xf   :  { %v46_v4 = vsel %vm45_vm1, %v44_v2, 63  ;;  %v49_v6 = vadd.s32 8, %v48_v3  ;;  %v50_v10 = vadd.s32 16, %v48_v3  ;;  %v51_v12 = vadd.s32 24, %v48_v3  ;;  %137 = vmatpush.msra.mxu0 %v87_v16  ;;  %184 = vmatpush.msra.mxu1 %v87_v16 }
  0x10   :  { %v56_v5 = vperm.slane %v46_v4, 0  ;;  %v52_v14 = vadd.s32 32, %v48_v3  ;;  %v53_v20 = vadd.s32 40, %v48_v3  ;;  %v54_v26 = vadd.s32 48, %v48_v3 }
  0x11   :  { %138 = vmatpush.msra.mxu0 %v86_v17  ;;  %185 = vmatpush.msra.mxu1 %v86_v17  ;;  %v55_v28 = vadd.s32 56, %v48_v3 }
  0x12   :  { %vm57_vm2 = vcmp.eq.s32.totalorder %v48_v3, %v56_v5  ;;  %vm58_vm3 = vcmp.eq.s32.totalorder %v49_v6, %v56_v5  ;;  %vm59_vm4 = vcmp.eq.s32.totalorder %v50_v10, %v56_v5  ;;  %vm60_vm5 = vcmp.eq.s32.totalorder %v51_v12, %v56_v5 }
  0x13   :  { %v173_v8 = vsel %vm57_vm2, 1.0, %v279_v7  ;;  %v174_v9 = vsel %vm58_vm3, 1.0, %v279_v7  ;;  %v175_v11 = vsel %vm59_vm4, 1.0, %v279_v7  ;;  %v176_v13 = vsel %vm60_vm5, 1.0, %v279_v7  ;;  %139 = vmatpush.msra.mxu0 %v85_v18  ;;  %186 = vmatpush.msra.mxu1 %v85_v18 }
  0x14   :  { %89 = vxpose.xlu0.b32.start [1/8] (short) (narrow) %v173_v8, 16  ;;  %vm61_vm6 = vcmp.eq.s32.totalorder %v52_v14, %v56_v5  ;;  %vm62_vm7 = vcmp.eq.s32.totalorder %v53_v20, %v56_v5  ;;  %vm63_vm8 = vcmp.eq.s32.totalorder %v54_v26, %v56_v5  ;;  %vm64_vm9 = vcmp.eq.s32.totalorder %v55_v28, %v56_v5 }
  0x15   :  { %v177_v19 = vsel %vm61_vm6, 1.0, %v279_v7  ;;  %140 = vmatpush.msra.mxu0 %v84_v21  ;;  %187 = vmatpush.msra.mxu1 %v84_v21  ;;  %v178_v25 = vsel %vm62_vm7, 1.0, %v279_v7  ;;  %v179_v27 = vsel %vm63_vm8, 1.0, %v279_v7  ;;  %v180_v29 = vsel %vm64_vm9, 1.0, %v279_v7 }
  0x17   :  { %141 = vmatpush.msra.mxu0 %v83_v22  ;;  %188 = vmatpush.msra.mxu1 %v83_v22 }
  0x19   :  { %142 = vmatpush.msra.mxu0 %v82_v23  ;;  %189 = vmatpush.msra.mxu1 %v82_v23 }
  0x1b   :  { %143 = vmatpush.msra.mxu0 %v81_v24  ;;  %190 = vmatpush.msra.mxu1 %v81_v24 }
  0x1c   :  { %90 = vxpose.xlu0.b32.cont [2/8] (short) (narrow) %v174_v9, 16 }
  0x24   :  { %91 = vxpose.xlu0.b32.cont [3/8] (short) (narrow) %v175_v11, 16 }
  0x2c   :  { %92 = vxpose.xlu0.b32.cont [4/8] (short) (narrow) %v176_v13, 16 }
  0x34   :  { %93 = vxpose.xlu0.b32.cont [5/8] (short) (narrow) %v177_v19, 16 }
  0x3c   :  { %94 = vxpose.xlu0.b32.cont [6/8] (short) (narrow) %v178_v25, 16 }
  0x44   :  { %95 = vxpose.xlu0.b32.cont [7/8] (short) (narrow) %v179_v27, 16 }
  0x4c   :  { %96 = vxpose.xlu0.b32.end [8/8] (short) (narrow) %v180_v29, 16 }
  0xb8   :  { %v105_v30 = vpop.trf.xlu0 }
  0xb9   :  { %181 = vmatmul.msk.f32.vlgmr.msra.gmra.mxu0 %vm121_vm10, %v105_v30 }
  0xc0   :  { %v106_v31 = vpop.trf.xlu0 }
  0xc1   :  { %182 = vmatmul.msk.f32.vlgmr.msra.gmra.mxu1 %vm121_vm10, %v106_v31 }
 0x136   :  { %v145_v32 = vpop.f32.mrf.mxu0 }
 0x137   :  { %151 = vst [vmem:[#allocation7] sm:$0xff] %v145_v32 }
 0x13e   :  { %v148_v33 = vpop.f32.mrf.mxu1 }
 0x13f   :  { %152 = vst [vmem:[#allocation7 + $0x8] sm:$0xff] %v148_v33 }
 0x140   :  { %165 = dma.vmem_to_hbm [thread:$0]  %s158_s1, 256, %s160_s23, [#allocation4], %s277_s19, %s277_s19, %s278_s20  }
 0x141   :  { %273 = dma.done.wait [#allocation4], 256  }
 0x142   :  { %274 = vsyncadd [#allocation4], 4294967040 }
 0x143   :  { %170 = vsyncpa [#allocation3], 1 }
 0x144   :  { %171 = vsyncpa [#allocation6], 1 }
 0x145   :  { %172 = vsyncpa [#allocation4], 1 }

</bundles_post_ra>
